<compile_context>
chip_gen: v7x
topology: tpu7x:2x2x1
jax: 0.10.0
libtpu: 0.0.40
codegen_flags: <defaults>
</compile_context>

<pallas_src>
import jax
import jax.numpy as jnp
from jax import lax
from jax.experimental import pallas as pl
from jax.experimental.pallas import tpu as pltpu


def _make_sepconv_kernel(NB, offs, Mpad, out_dtype):
    def kernel(x_ref, wc_ref, b_ref, o_ref):
        # x_ref:  (NB, Cp, Lflat)  flattened, zero-padded inputs (compute dtype, bf16)
        # wc_ref: (OC, K)          combined depthwise*pointwise weight (compute dtype)
        # b_ref:  (OC, 1)          f32 pointwise bias
        # o_ref:  (NB, OC, Mpad)   lane-dense stride-1 output, Mpad % 128 == 0
        wc = wc_ref[...]
        # im2col for every example in the block ("flat shifts"), concatenated along the
        # 128-aligned lane axis -> ONE fused depthwise+pointwise matmul for the whole block.
        per_n = []
        for n in range(NB):                                   # static, small
            xn = x_ref[n]                                     # (Cp, Lflat)
            cols = [xn[:, off:off + Mpad] for off in offs]    # KH*KW x (Cp, Mpad)
            per_n.append(jnp.concatenate(cols, axis=0))       # (K, Mpad)
        patches = per_n[0] if NB == 1 else jnp.concatenate(per_n, axis=1)  # (K, NB*Mpad)
        res = jnp.dot(wc, patches, preferred_element_type=jnp.float32)     # (OC, NB*Mpad)
        res = res + b_ref[...]                                # one f32 broadcast + add
        for n in range(NB):                                   # NB lane-dense (OC, Mpad) stores
            o_ref[n] = res[:, n * Mpad:(n + 1) * Mpad].astype(out_dtype)
    return kernel


def _pick_block(N, Cp, Lflat, OC, K, Mpad, cbytes, obytes):
    """Batch block size + scoped-VMEM request.

    Prefer >= 2 grid blocks (v7x has 2 TensorCores and the grid axis is "parallel"); cap the
    block so double-buffered blocks + im2col buffer stay well inside v7x's 64 MiB VMEM.
    """
    budget = 44 * 1024 * 1024

    def vmem_need(nb):
        x_blk = 2 * nb * Cp * Lflat * cbytes          # double-buffered input block
        o_blk = 2 * nb * OC * Mpad * obytes           # double-buffered output block
        patches = K * nb * Mpad * cbytes              # im2col buffer (compute dtype)
        res = OC * nb * Mpad * 4                      # f32 matmul result
        w = 2 * (OC * K * cbytes + OC * 4)            # weights + bias
        return x_blk + o_blk + patches + res + w

    nb = max(1, min(16, -(-N // 2)))                  # >= 2 blocks once N >= 2
    while nb > 1 and vmem_need(nb) > budget:
        nb -= 1
    vmem = int(min(64 * 1024 * 1024, max(32 * 1024 * 1024, 2 * vmem_need(nb))))
    return nb, vmem


def separable_conv2d(x, w_dw, w_pw, bias, *, stride=(1, 1), padding=(0, 0),
                     dilation=(1, 1), D=1, compute_dtype=jnp.bfloat16):
    """Forward pass of SeparableConv2d (depthwise conv, groups=C, then pointwise 1x1 conv).

    x:    (N, C, H, W)       NCHW, like the PyTorch module
    w_dw: (C*D, 1, KH, KW)   depthwise weight (groups=C, no bias)
    w_pw: (OC, C*D, 1, 1)    pointwise weight
    bias: (OC,)              pointwise bias
    returns (N, OC, OH, OW) in NCHW, dtype of x.
    """
    N, C, H, W = x.shape
    CD, _, KH, KW = w_dw.shape
    assert CD == C * D
    OC = w_pw.shape[0]
    ph, pw_ = padding
    sh, sw = stride
    dh, dwid = dilation

    Hp, Wp = H + 2 * ph, W + 2 * pw_
    OHd = Hp - dh * (KH - 1)            # stride-1 ("dense") output extents
    OWd = Wp - dwid * (KW - 1)
    assert OHd > 0 and OWd > 0

    M = OHd * Wp                        # flat dense output length per example
    Mpad = -(-M // 128) * 128           # 128-aligned lanes -> unmasked stores
    sub = 16 if jnp.dtype(compute_dtype).itemsize == 2 else 8
    Cp = -(-C // sub) * sub             # pad channels to the compute-dtype sublane pack
    K = KH * KW * Cp

    # flat slack so the furthest tap's Mpad-long slice stays in bounds
    max_off = (KH - 1) * dh * Wp + (KW - 1) * dwid
    extra_flat = max(max_off + Mpad - Hp * Wp, 0)
    extra_rows = -(-extra_flat // Wp)
    Lflat = (Hp + extra_rows) * Wp

    cbytes = jnp.dtype(compute_dtype).itemsize
    obytes = jnp.dtype(x.dtype).itemsize
    NB, vmem_bytes = _pick_block(N, Cp, Lflat, OC, K, Mpad, cbytes, obytes)
    n_blocks = -(-N // NB)
    Npad = n_blocks * NB

    # ---- ONE pad pass: batch, channel, spatial and flat-tail padding together ----
    x_pad = jnp.pad(x.astype(compute_dtype),
                    ((0, Npad - N), (0, Cp - C), (ph, ph + extra_rows), (pw_, pw_)))
    x_flat = x_pad.reshape(Npad, Cp, Lflat)       # free reshape (contiguous)

    # ---- fold depthwise * pointwise (and the D replication) into one (OC, K) weight ----
    # depthwise output channel m = c*D + d reads input channel c
    wdw_r = w_dw[:, 0, :, :].reshape(C, D, KH, KW).astype(jnp.float32)
    wpw_r = w_pw[:, :, 0, 0].reshape(OC, C, D).astype(jnp.float32)
    wc = (wdw_r[None] * wpw_r[:, :, :, None, None]).sum(axis=2)       # (OC, C, KH, KW)
    wc = jnp.transpose(wc, (0, 2, 3, 1))                               # (OC, KH, KW, C)
    wc = jnp.pad(wc, ((0, 0), (0, 0), (0, 0), (0, Cp - C)))
    wc = wc.reshape(OC, K).astype(compute_dtype)
    b2 = bias.reshape(OC, 1).astype(jnp.float32)

    offs = tuple(kh * dh * Wp + kw * dwid for kh in range(KH) for kw in range(KW))
    kernel = _make_sepconv_kernel(NB, offs, Mpad, x.dtype)

    cost = pl.CostEstimate(
        flops=2 * OC * K * Mpad * Npad,
        transcendentals=0,
        bytes_accessed=x_flat.size * cbytes + wc.size * cbytes + Npad * OC * Mpad * obytes,
    )

    out_flat = pl.pallas_call(
        kernel,
        out_shape=jax.ShapeDtypeStruct((Npad, OC, Mpad), x.dtype),
        grid=(n_blocks,),
        in_specs=[
            pl.BlockSpec((NB, Cp, Lflat), lambda b: (b, 0, 0)),
            pl.BlockSpec((OC, K), lambda b: (0, 0)),
            pl.BlockSpec((OC, 1), lambda b: (0, 0)),
        ],
        out_specs=pl.BlockSpec((NB, OC, Mpad), lambda b: (b, 0, 0)),
        compiler_params=pltpu.CompilerParams(
            dimension_semantics=("parallel",),
            vmem_limit_bytes=vmem_bytes),
        cost_estimate=cost,
    )(x_flat, wc, b2)

    # one fused slice+reshape+subsample pass: drops the lane pad, the cross-row wraparound
    # columns (>= OWd), the stride-skipped positions, and the batch padding.
    out = out_flat[:N, :, :M].reshape(N, OC, OHd, Wp)[:, :, ::sh, :OWd:sw]
    return out


def _reference(x, w_dw, w_pw, bias, stride, padding, dilation, groups):
    """Pure-JAX reference matching torch.nn.Conv2d semantics (for verification)."""
    dw = lax.conv_general_dilated(
        x, w_dw, window_strides=stride,
        padding=[(padding[0], padding[0]), (padding[1], padding[1])],
        rhs_dilation=dilation,
        dimension_numbers=("NCHW", "OIHW", "NCHW"),
        feature_group_count=groups,
        precision=lax.Precision.HIGHEST)
    out = lax.conv_general_dilated(
        dw, w_pw, window_strides=(1, 1), padding="VALID",
        dimension_numbers=("NCHW", "OIHW", "NCHW"),
        precision=lax.Precision.HIGHEST)
    return out + bias.reshape(1, -1, 1, 1)


if __name__ == "__main__":
    # Small shapes consistent with SeparableConv2d(in_channels=4, out_channels=8,
    # kernel_size=(3,3), padding=(1,1), D=2, bias=True) applied to x of shape (2, 4, 16, 16).
    N, C, H, W = 2, 4, 16, 16
    D = 2
    OC = 8
    KH, KW = 3, 3
    stride = (1, 1)
    padding = (1, 1)
    dilation = (1, 1)
    CD = C * D

    key = jax.random.PRNGKey(0)
    kx, kdw, kpw, kb = jax.random.split(key, 4)
    x = jax.random.normal(kx, (N, C, H, W), dtype=jnp.float32)
    # deterministic synthetic parameters (shapes as in the nn.Module __init__)
    w_dw = 0.1 * jax.random.normal(kdw, (CD, 1, KH, KW), dtype=jnp.float32)   # depthwise, groups=C
    w_pw = 0.1 * jax.random.normal(kpw, (OC, CD, 1, 1), dtype=jnp.float32)    # pointwise 1x1
    bias = 0.1 * jax.random.normal(kb, (OC,), dtype=jnp.float32)

    out = separable_conv2d(x, w_dw, w_pw, bias, stride=stride, padding=padding,
                           dilation=dilation, D=D)
    out = jax.block_until_ready(out)

    ref = _reference(x, w_dw, w_pw, bias, stride, padding, dilation, groups=C)
    ref = jax.block_until_ready(ref)

    assert out.shape == ref.shape, (out.shape, ref.shape)
    # bf16 matmul operands with f32 accumulation: tolerance sized for bf16 quantization
    assert jnp.allclose(out, ref, atol=2e-2, rtol=2e-2), float(jnp.max(jnp.abs(out - ref)))
    print("KERNEL_OK")
</pallas_src>

<mosaic_0001>
module attributes {stable_mosaic.version = 11 : i64} {
  func.func @kernel(%arg0: i32, %arg1: memref<1x16x432xbf16, #tpu.memory_space<vmem>>, %arg2: memref<8x144xbf16, #tpu.memory_space<vmem>>, %arg3: memref<8x1xf32, #tpu.memory_space<vmem>>, %arg4: memref<1x8x384xf32, #tpu.memory_space<vmem>>) attributes {dimension_semantics = [#tpu.dimension_semantics<parallel>], iteration_bounds = array<i64: 2>, scalar_prefetch = 0 : i64, scratch_operands = 0 : i64, tpu.core_type = #tpu.core_type<tc>, window_params = [{transform_indices = @transform_0, window_bounds = array<i64: 1, 16, 432>}, {pipeline_mode = #tpu.pipeline_mode<synchronous>, transform_indices = @transform_1, window_bounds = array<i64: 8, 144>}, {pipeline_mode = #tpu.pipeline_mode<synchronous>, transform_indices = @transform_2, window_bounds = array<i64: 8, 1>}, {transform_indices = @transform_3, window_bounds = array<i64: 1, 8, 384>}]} {
    %c0 = arith.constant 0 : index
    %c0_0 = arith.constant 0 : index
    %0 = vector.load %arg2[%c0, %c0_0] : memref<8x144xbf16, #tpu.memory_space<vmem>>, vector<8x144xbf16>
    %c0_1 = arith.constant 0 : index
    %c0_2 = arith.constant 0 : index
    %c0_3 = arith.constant 0 : index
    %1 = vector.load %arg1[%c0_1, %c0_2, %c0_3] : memref<1x16x432xbf16, #tpu.memory_space<vmem>>, vector<1x16x432xbf16>
    %2 = vector.shape_cast %1 : vector<1x16x432xbf16> to vector<16x432xbf16>
    %3 = vector.extract_strided_slice %2 {offsets = [0, 0], sizes = [16, 384], strides = [1, 1]} : vector<16x432xbf16> to vector<16x384xbf16>
    %4 = vector.extract_strided_slice %2 {offsets = [0, 1], sizes = [16, 384], strides = [1, 1]} : vector<16x432xbf16> to vector<16x384xbf16>
    %5 = vector.extract_strided_slice %2 {offsets = [0, 2], sizes = [16, 384], strides = [1, 1]} : vector<16x432xbf16> to vector<16x384xbf16>
    %6 = vector.extract_strided_slice %2 {offsets = [0, 18], sizes = [16, 384], strides = [1, 1]} : vector<16x432xbf16> to vector<16x384xbf16>
    %7 = vector.extract_strided_slice %2 {offsets = [0, 19], sizes = [16, 384], strides = [1, 1]} : vector<16x432xbf16> to vector<16x384xbf16>
    %8 = vector.extract_strided_slice %2 {offsets = [0, 20], sizes = [16, 384], strides = [1, 1]} : vector<16x432xbf16> to vector<16x384xbf16>
    %9 = vector.extract_strided_slice %2 {offsets = [0, 36], sizes = [16, 384], strides = [1, 1]} : vector<16x432xbf16> to vector<16x384xbf16>
    %10 = vector.extract_strided_slice %2 {offsets = [0, 37], sizes = [16, 384], strides = [1, 1]} : vector<16x432xbf16> to vector<16x384xbf16>
    %11 = vector.extract_strided_slice %2 {offsets = [0, 38], sizes = [16, 384], strides = [1, 1]} : vector<16x432xbf16> to vector<16x384xbf16>
    %12 = tpu.concatenate %3, %4, %5, %6, %7, %8, %9, %10, %11 in 0 : vector<16x384xbf16>, vector<16x384xbf16>, vector<16x384xbf16>, vector<16x384xbf16>, vector<16x384xbf16>, vector<16x384xbf16>, vector<16x384xbf16>, vector<16x384xbf16>, vector<16x384xbf16> -> vector<144x384xbf16>
    %cst = arith.constant dense<0.000000e+00> : vector<8x384xf32>
    %13 = tpu.matmul %0, %12, %cst {dimension_numbers = #tpu.dot_dimension_numbers<[1], [0], [0], [1], [0, 0, 1, 1], [], []>} : vector<8x144xbf16>, vector<144x384xbf16>, vector<8x384xf32> -> vector<8x384xf32>
    %c0_4 = arith.constant 0 : index
    %c0_5 = arith.constant 0 : index
    %14 = vector.load %arg3[%c0_4, %c0_5] : memref<8x1xf32, #tpu.memory_space<vmem>>, vector<8x1xf32>
    %15 = vector.broadcast %14 : vector<8x1xf32> to vector<8x384xf32>
    %16 = arith.addf %13, %15 : vector<8x384xf32>
    %c0_6 = arith.constant 0 : index
    %c0_7 = arith.constant 0 : index
    %c0_8 = arith.constant 0 : index
    %17 = vector.load %arg4[%c0_6, %c0_7, %c0_8] : memref<1x8x384xf32, #tpu.memory_space<vmem>>, vector<1x8x384xf32>
    %18 = vector.shape_cast %17 : vector<1x8x384xf32> to vector<8x384xf32>
    %19 = vector.shape_cast %16 : vector<8x384xf32> to vector<1x8x384xf32>
    tpu.vector_store %arg4[%c0_6, %c0_7, %c0_8], %19 {strides = array<i32>} : memref<1x8x384xf32, #tpu.memory_space<vmem>>, vector<1x8x384xf32>,
    return
  }
  func.func @transform_0(%arg0: i32) -> (i32, i32, i32) {
    %c0_i32 = arith.constant 0 : i32
    %c0_i32_0 = arith.constant 0 : i32
    %c0_i32_1 = arith.constant 0 : i32
    return %arg0, %c0_i32, %c0_i32_0 : i32, i32, i32
  }
  func.func @transform_1(%arg0: i32) -> (i32, i32) {
    %c0_i32 = arith.constant 0 : i32
    %c0_i32_0 = arith.constant 0 : i32
    %c0_i32_1 = arith.constant 0 : i32
    return %c0_i32, %c0_i32_0 : i32, i32
  }
  func.func @transform_2(%arg0: i32) -> (i32, i32) {
    %c0_i32 = arith.constant 0 : i32
    %c0_i32_0 = arith.constant 0 : i32
    %c0_i32_1 = arith.constant 0 : i32
    return %c0_i32, %c0_i32_0 : i32, i32
  }
  func.func @transform_3(%arg0: i32) -> (i32, i32, i32) {
    %c0_i32 = arith.constant 0 : i32
    %c0_i32_0 = arith.constant 0 : i32
    %c0_i32_1 = arith.constant 0 : i32
    return %arg0, %c0_i32, %c0_i32_0 : i32, i32, i32
  }
}

</mosaic_0001>

<bundles_post_ra>
// kernel: tpu_custom_call.1
= control target key start
LH: loop header
LB: loop body
LE: loop exit
PB: predicated region body
PF: predicated region fallthrough
CT: control target
= control target key end

     0   :  { %8 = vsyncpa [#allocation3], 0  ;;  %s921_s0 = inlined_call_operand.hbm [shape: bf16[2,16,432], index: 0, kind: input, shape index: {}]   ;;  %s922_s1 = inlined_call_operand.vmem [shape: bf16[8,144], index: 1, kind: input, shape index: {}]   ;;  %s923_s2 = inlined_call_operand.vmem [shape: f32[8,1], index: 2, kind: input, shape index: {}]   ;;  %s924_s3 = inlined_call_operand.hbm [shape: f32[2,8,384], index: 3, kind: output, shape index: {}]  }
   0x1   :  { %10 = vsyncpa [#allocation3 + $0x1], 0 }
   0x2   :  { %11 = vsyncpa [#allocation4], 0 }
   0x3   :  { %13 = vsyncpa [#allocation4 + $0x1], 0  ;;  %s738_s12 = smov 0   ;;  %s740_s13 = smov 0  }
   0x4   :  { %s742_s14 = smov 0   ;;  %s744_s15 = smov 0  }
   0x5 LB: > { %s759_s16 = sadd.s32 4294967295, %s703_s15   ;;  %s519_s17 = sadd.s32 4294967294, %s703_s15   ;;  %s703_s15 = sphi %s744_s15, %s937_s15   ;;  %s699_s14 = sphi %s742_s14, %s936_s14   ;;  %s695_s13 = sphi %s740_s13, %s935_s13   ;;  %s691_s12 = sphi %s738_s12, %s934_s12  }
   0x6   : > { %s763_s18 = sadd.s32 1, %s703_s15   ;;  %s26_s19 = sadd.s32 1, %s699_s14 }
   0x7   : > { %s23_s20 = ssub.s32 %s703_s15, %s763_s18  ;;  %p33_p0 = scmp.ne.s32.totalorder %s699_s14, %s695_s13 }
   0x8   : > { %p24_p1 = scmp.eq.s32.totalorder %s23_s20, 0  ;;  %p34_p2 = scmp.eq.s32.totalorder %s703_s15, 0 }
   0x9   : > { %p39_p3 = scmp.ne.s32.totalorder %s695_s13, %s691_s12  ;;  %p40_p4 = scmp.eq.s32.totalorder %s759_s16, 0 }
   0xa   : > { %s775_s21 = scalar_select %p24_p1, %s699_s14, %s26_s19  }
   0xb   : > { %p777_p5 = por %p34_p2, %p33_p0  ;;  %p781_p6 = por %p40_p4, %p39_p3 }
   0xc   : > { %p105_p7 = scmp.eq.s32.totalorder %s759_s16, 1  ;;  %p111_p8 = scmp.eq.s32.totalorder %s519_s17, 1 }
   0xd   : > { %p553_p10 = scmp.lt.s32.totalorder %s703_s15, 2  ;;  %s137_s26 = sand.u32 1, %s699_s14  }
   0xe   : > { %p788_p11 = por %p105_p7, %p33_p0  ;;  %p792_p12 = por %p111_p8, %p39_p3 }
   0xf   : > { %s538_s27 = sshll.u32 %s703_s15, 9  ;;  %s522_s28 = sshll.u32 %s137_s26, 5 }
  0x10   : > { %s928_s24 = scalar_select %p788_p11, 1, 0 }
  0x11   : > { %s929_s25 = scalar_select %p792_p12, 1, 0 }
  0x12   : > { %s801_s4 = scalar_lea.hbm %s921_s0, %s538_s27  ;;  %s141_s5 = scalar_lea.vmem [#allocation2], %s522_s28 }
  0x13   : > { %s148_s6 = sshll.u32 %s141_s5, 4  ;;  %p805_p13 = pnand %p553_p10, %p777_p5  ;;  %s809_s6 = int_to_ptr.vmem [resolvable:$true] %s148_s6 }
  0x14   : > { %s811_s8 = scalar_lea.sflag [#allocation3], %s137_s26  ;;  %s607_s9 = scalar_lea.hbm %s801_s4, 512 }
  0x15   : > { %p608_p0 = scmp.ne.s32.totalorder %s801_s4, %s607_s9  ;;  %p609_p1 = pneg %p805_p13 }
  0x16   : > { %s612_s17 = scalar_lea.hbm %s921_s0, 1024  ;;  %p613_p4 = scmp.lt.u32.totalorder %s801_s4, %s921_s0 }
  0x17   : > { %p610_p2 = pnand %p609_p1, %p608_p0  ;;  %p614_p5 = scmp.lt.u32.totalorder %s612_s17, %s607_s9 }
  0x18   : > { %p616_p8 = scmp.lt.u32.totalorder %s607_s9, %s801_s4 }
  0x19   : > { %p611_p3 = pneg %p610_p2  ;;  %p615_p7 = por %p614_p5, %p613_p4 }
  0x1b   : > { %p617_p10 = por %p616_p8, %p615_p7 }
  0x1d   : > { %p618_p9 = pnand %p617_p10, %p611_p3 }
  0x1f   : > { %621 = shalt.err (!%p618_p9)
}
  0x20   : > { %s622_s22 = scalar_lea.vmem %s809_s6, 512  ;;  %s705_s26 = smov [#allocation2]  }
  0x21   : > { %p623_p0 = scmp.ne.s32.totalorder %s809_s6, %s622_s22  ;;  %s627_s27 = sshll.u32 %s705_s26, 4  ;;  %s628_s27 = int_to_ptr.vmem [resolvable:$false] %s627_s27 }
  0x22   : > { %s629_s28 = scalar_lea.vmem %s628_s27, 1024  ;;  %p630_p11 = scmp.lt.s32.totalorder %s809_s6, %s628_s27 }
  0x23   : > { %p625_p2 = pnand %p623_p0, %p609_p1  ;;  %p631_p4 = scmp.lt.s32.totalorder %s629_s28, %s622_s22 }
  0x25   : > { %p626_p12 = pneg %p625_p2  ;;  %p632_p5 = por %p631_p4, %p630_p11 }
  0x27   : > { %p633_p7 = pnand %p632_p5, %p626_p12 }
  0x29   : > { %636 = shalt.err (!%p633_p7)
}
  0x2a   : > { %s706_s29 = smov 256   ;;  %s707_s30 = smov 16  }
  0x2b   : > { %548 = dma.hbm_to_vmem [thread:$0]  (!%p805_p13), %s801_s4, 512, %s809_s6, %s811_s8, %s706_s29, %s706_s29, %s707_s30  }
  0x2c   : > { %p525_p9 = scmp.ge.s32.totalorder %s703_s15, 1  ;;  %p156_p1 = scmp.lt.s32.totalorder %s703_s15, 3 }
  0x2e   : > { %p157_p3 = pnand %p525_p9, %p156_p1 }
  0x2f   : > { %s842_s5 = sand.u32 (!%p157_p3), 1, %s695_s13  }
  0x30   : > { %160 = sbr.rel (%p157_p3) target bundleno = 466 (0x1d2), region = 32  ;;  %s526_s9 = sshll.u32 (!%p157_p3), %s842_s5, 5 }
  0x31   : > { %s163_s10 = scalar_lea.sflag (!%p157_p3), [#allocation3], %s842_s5  ;;  %s166_s11 = scalar_lea.vmem (!%p157_p3), [#allocation2], %s526_s9 }
  0x37   : > { %682 = dma.done.wait (%p781_p6), %s163_s10, 512  }
  0x38   : > { %684 = vsyncadd (%p781_p6), %s163_s10, 4294966784  ;;  %v708_v0 = vmov 0   ;;  %v599_v1 = vld [vmem:[%s166_s11 + $0x4] ss:$16 sps:$4 sm:$0xff]   ;;  %v601_v2 = vld [vmem:[%s166_s11] ss:$16 sps:$4 sm:$0xff]  }
  0x39   : > { %391 = vmatprep.subr.bf16.mxu1 %v708_v0  ;;  %598 = vset.pattern.permute.xlu0 %v708_v0  ;;  %s709_s4 = smov 127   ;;  %v602_v3 = vld [vmem:[%s166_s11 + $0x8] ss:$16 sps:$4 sm:$0xff]   ;;  %v604_v4 = vld [vmem:[%s166_s11 + $0xc] ss:$16 sps:$4 sm:$0xff]   ;;  %s710_s23 = smov 126  }
  0x3a   : > { %216 = vrot.lane.b32.xlu0 %v599_v1, %s709_s4  ;;  %350 = vmatprep.subr.bf16.mxu0 %v599_v1  ;;  %s711_s6 = smov 110   ;;  %s712_s7 = smov 109   ;;  %v856_v5 = vld [vmem:[%s922_s1] sm:$0xff]  ;;  %vm346_vm0 = vcmask 130048   ;;  %vm222_vm1 = vcmask 1039360   ;;  %vm237_vm2 = vcmask 1031168  }
  0x3b   : > { %214 = vrot.lane.b32.xlu1 %v601_v2, %s709_s4  ;;  %351 = vmatpush1.bf16.msra.mxu0 %v601_v2  ;;  %s713_s8 = smov 108   ;;  %s714_s17 = smov 92   ;;  %v532_v6 = vcombine.high %v856_v5, %v856_v5  ;;  %v334_v7 = vld [vmem:[%s923_s2] sm:$0xff]  ;;  %vm252_vm3 = vcmask 900096   ;;  %vm267_vm4 = vcmask 891904   ;;  %vm282_vm5 = vcmask 883712  }
  0x3c   : > { %392 = vmatpush1.bf16.msra.mxu1 %v602_v3  ;;  %s715_s19 = smov 91   ;;  %s716_s26 = smov 90   ;;  %vm297_vm6 = vcmask 752640   ;;  %vm312_vm7 = vcmask 744448   ;;  %vm327_vm8 = vcmask 736256   ;;  %v531_v63 = vcombine.low %v856_v5, %v856_v5 }
  0x3d   : > { %393 = vmatprep.subr.bf16.mxu1 %v708_v0  ;;  %533 = vmatprep.mubr.msk.bf16.mxu0 %vm346_vm0, %v532_v6  ;;  %s539_s29 = smul.u32 24, %s842_s5  ;;  %p931_p11 = scmp.ne.s32.totalorder %s928_s24, 0 }
  0x3e   : > { %218 = vrot.lane.b32.xlu0 %v602_v3, %s709_s4  ;;  %534 = vmatprep.mubr.msk.bf16.mxu1 %vm346_vm0, %v532_v6  ;;  %s540_s30 = smul.u32 384, %s759_s16  ;;  %s435_s16 = scalar_lea.sflag [#allocation4], %s842_s5 }
  0x3f   : > { %220 = vrot.lane.b32.xlu1 %v604_v4, %s709_s4  ;;  %s188_s9 = scalar_lea.vmem [#allocation5], %s539_s29 }
  0x40   : > { %s449_s10 = sshll.u32 %s188_s9, 4  ;;  %s879_s10 = int_to_ptr.vmem [resolvable:$true] %s449_s10 }
  0x42   : > { %231 = vrot.lane.b32.xlu0 %v599_v1, %s710_s23 }
  0x43   : > { %233 = vrot.lane.b32.xlu1 %v602_v3, %s710_s23 }
  0x46   : > { %229 = vrot.lane.b32.xlu0 %v601_v2, %s710_s23 }
  0x47   : > { %235 = vrot.lane.b32.xlu1 %v604_v4, %s710_s23  ;;  %s877_s23 = scalar_lea.hbm %s924_s3, %s540_s30 }
  0x4a   : > { %246 = vrot.lane.b32.xlu0 %v599_v1, %s711_s6 }
  0x4b   : > { %248 = vrot.lane.b32.xlu1 %v602_v3, %s711_s6 }
  0x4e   : > { %244 = vrot.lane.b32.xlu0 %v601_v2, %s711_s6 }
  0x4f   : > { %250 = vrot.lane.b32.xlu1 %v604_v4, %s711_s6  ;;  %s637_s6 = scalar_lea.vmem %s879_s10, 384 }
  0x50   : > { %p638_p6 = scmp.ne.s32.totalorder %s879_s10, %s637_s6 }
  0x52   : > { %261 = vrot.lane.b32.xlu0 %v599_v1, %s712_s7  ;;  %p639_p12 = pnand %p638_p6, %p931_p11 }
  0x53   : > { %263 = vrot.lane.b32.xlu1 %v602_v3, %s712_s7 }
  0x54   : > { %p640_p13 = pneg %p639_p12 }
  0x56   : > { %259 = vrot.lane.b32.xlu0 %v601_v2, %s712_s7 }
  0x57   : > { %265 = vrot.lane.b32.xlu1 %v604_v4, %s712_s7  ;;  %s717_s7 = smov [#allocation5]  }
  0x5a   : > { %276 = vrot.lane.b32.xlu0 %v599_v1, %s713_s8 }
  0x5b   : > { %278 = vrot.lane.b32.xlu1 %v602_v3, %s713_s8 }
  0x5e   : > { %274 = vrot.lane.b32.xlu0 %v601_v2, %s713_s8 }
  0x5f   : > { %280 = vrot.lane.b32.xlu1 %v604_v4, %s713_s8  ;;  %s641_s8 = sshll.u32 %s717_s7, 4  ;;  %s642_s8 = int_to_ptr.vmem [resolvable:$false] %s641_s8 }
  0x60   : > { %p644_p8 = scmp.lt.s32.totalorder %s879_s10, %s642_s8 }
  0x62   : > { %291 = vrot.lane.b32.xlu0 %v599_v1, %s714_s17 }
  0x63   : > { %293 = vrot.lane.b32.xlu1 %v602_v3, %s714_s17 }
  0x66   : > { %289 = vrot.lane.b32.xlu0 %v601_v2, %s714_s17 }
  0x67   : > { %295 = vrot.lane.b32.xlu1 %v604_v4, %s714_s17  ;;  %s643_s17 = scalar_lea.vmem %s642_s8, 768 }
  0x68   : > { %p645_p10 = scmp.lt.s32.totalorder %s643_s17, %s637_s6 }
  0x6a   : > { %306 = vrot.lane.b32.xlu0 %v599_v1, %s715_s19  ;;  %p646_p0 = por %p645_p10, %p644_p8 }
  0x6b   : > { %308 = vrot.lane.b32.xlu1 %v602_v3, %s715_s19 }
  0x6c   : > { %p647_p2 = pnand %p646_p0, %p640_p13 }
  0x6e   : > { %304 = vrot.lane.b32.xlu0 %v601_v2, %s715_s19 }
  0x6f   : > { %310 = vrot.lane.b32.xlu1 %v604_v4, %s715_s19 }
  0x72   : > { %321 = vrot.lane.b32.xlu0 %v599_v1, %s716_s26 }
  0x73   : > { %323 = vrot.lane.b32.xlu1 %v602_v3, %s716_s26 }
  0x76   : > { %319 = vrot.lane.b32.xlu0 %v601_v2, %s716_s26 }
  0x77   : > { %325 = vrot.lane.b32.xlu1 %v604_v4, %s716_s26 }
  0x7a   : > { %337 = vperm.xlu0 %598, %v334_v7  }
  0xac   : > { %v217_v8 = vpop.permute.xlu0 %216 }
  0xad   : > { %v215_v9 = vpop.permute.xlu1 %214 }
  0xae   : > { %v223_v14 = vsel %vm222_vm1, %v215_v9, %v217_v8 }
  0xb0   : > { %v219_v10 = vpop.permute.xlu0 %218 }
  0xb1   : > { %v221_v11 = vpop.permute.xlu1 %220  ;;  %v224_v12 = vsel %vm222_vm1, %v217_v8, %v219_v10 }
  0xb2   : > { %352 = vmatprep.subr.bf16.mxu0 %v224_v12  ;;  %v225_v13 = vsel %vm222_vm1, %v219_v10, %v221_v11 }
  0xb3   : > { %394 = vmatpush1.bf16.msra.mxu1 %v225_v13  ;;  %353 = vmatpush1.bf16.msra.mxu0 %v223_v14 }
  0xb4   : > { %v232_v15 = vpop.permute.xlu0 %231  ;;  %395 = vmatprep.subr.bf16.mxu1 %v708_v0 }
  0xb5   : > { %v234_v16 = vpop.permute.xlu1 %233 }
  0xb6   : > { %v239_v17 = vsel %vm237_vm2, %v232_v15, %v234_v16 }
  0xb7   : > { %354 = vmatprep.subr.bf16.mxu0 %v239_v17 }
  0xb8   : > { %v230_v18 = vpop.permute.xlu0 %229 }
  0xb9   : > { %v236_v19 = vpop.permute.xlu1 %235  ;;  %v238_v20 = vsel %vm237_vm2, %v230_v18, %v232_v15 }
  0xba   : > { %355 = vmatpush1.bf16.msra.mxu0 %v238_v20  ;;  %v240_v21 = vsel %vm237_vm2, %v234_v16, %v236_v19 }
  0xbb   : > { %396 = vmatpush1.bf16.msra.mxu1 %v240_v21 }
  0xbc   : > { %v247_v22 = vpop.permute.xlu0 %246  ;;  %397 = vmatprep.subr.bf16.mxu1 %v708_v0 }
  0xbd   : > { %v249_v23 = vpop.permute.xlu1 %248 }
  0xbe   : > { %v254_v24 = vsel %vm252_vm3, %v247_v22, %v249_v23 }
  0xbf   : > { %356 = vmatprep.subr.bf16.mxu0 %v254_v24 }
  0xc0   : > { %v245_v25 = vpop.permute.xlu0 %244 }
  0xc1   : > { %v251_v26 = vpop.permute.xlu1 %250  ;;  %v253_v27 = vsel %vm252_vm3, %v245_v25, %v247_v22 }
  0xc2   : > { %357 = vmatpush1.bf16.msra.mxu0 %v253_v27  ;;  %v255_v28 = vsel %vm252_vm3, %v249_v23, %v251_v26 }
  0xc3   : > { %398 = vmatpush1.bf16.msra.mxu1 %v255_v28 }
  0xc4   : > { %v262_v29 = vpop.permute.xlu0 %261  ;;  %399 = vmatprep.subr.bf16.mxu1 %v708_v0 }
  0xc5   : > { %v264_v30 = vpop.permute.xlu1 %263 }
  0xc6   : > { %v269_v31 = vsel %vm267_vm4, %v262_v29, %v264_v30 }
  0xc7   : > { %358 = vmatprep.subr.bf16.mxu0 %v269_v31 }
  0xc8   : > { %v260_v32 = vpop.permute.xlu0 %259 }
  0xc9   : > { %v266_v33 = vpop.permute.xlu1 %265  ;;  %v268_v34 = vsel %vm267_vm4, %v260_v32, %v262_v29 }
  0xca   : > { %359 = vmatpush1.bf16.msra.mxu0 %v268_v34  ;;  %v270_v35 = vsel %vm267_vm4, %v264_v30, %v266_v33 }
  0xcb   : > { %400 = vmatpush1.bf16.msra.mxu1 %v270_v35 }
  0xcc   : > { %v277_v36 = vpop.permute.xlu0 %276  ;;  %401 = vmatprep.subr.bf16.mxu1 %v708_v0 }
  0xcd   : > { %v279_v37 = vpop.permute.xlu1 %278 }
  0xce   : > { %v284_v38 = vsel %vm282_vm5, %v277_v36, %v279_v37 }
  0xcf   : > { %360 = vmatprep.subr.bf16.mxu0 %v284_v38 }
  0xd0   : > { %v275_v39 = vpop.permute.xlu0 %274 }
  0xd1   : > { %v281_v40 = vpop.permute.xlu1 %280  ;;  %v283_v41 = vsel %vm282_vm5, %v275_v39, %v277_v36 }
  0xd2   : > { %361 = vmatpush1.bf16.msra.mxu0 %v283_v41  ;;  %v285_v42 = vsel %vm282_vm5, %v279_v37, %v281_v40 }
  0xd3   : > { %402 = vmatpush1.bf16.msra.mxu1 %v285_v42 }
  0xd4   : > { %v292_v43 = vpop.permute.xlu0 %291  ;;  %403 = vmatprep.subr.bf16.mxu1 %v708_v0 }
  0xd5   : > { %v294_v44 = vpop.permute.xlu1 %293 }
  0xd6   : > { %v299_v45 = vsel %vm297_vm6, %v292_v43, %v294_v44 }
  0xd7   : > { %362 = vmatprep.subr.bf16.mxu0 %v299_v45 }
  0xd8   : > { %v290_v46 = vpop.permute.xlu0 %289 }
  0xd9   : > { %v296_v47 = vpop.permute.xlu1 %295  ;;  %v298_v48 = vsel %vm297_vm6, %v290_v46, %v292_v43 }
  0xda   : > { %363 = vmatpush1.bf16.msra.mxu0 %v298_v48  ;;  %v300_v49 = vsel %vm297_vm6, %v294_v44, %v296_v47 }
  0xdb   : > { %404 = vmatpush1.bf16.msra.mxu1 %v300_v49 }
  0xdc   : > { %v307_v50 = vpop.permute.xlu0 %306  ;;  %405 = vmatprep.subr.bf16.mxu1 %v708_v0 }
  0xdd   : > { %v309_v51 = vpop.permute.xlu1 %308 }
  0xde   : > { %v314_v52 = vsel %vm312_vm7, %v307_v50, %v309_v51 }
  0xdf   : > { %364 = vmatprep.subr.bf16.mxu0 %v314_v52 }
  0xe0   : > { %v305_v53 = vpop.permute.xlu0 %304 }
  0xe1   : > { %v311_v54 = vpop.permute.xlu1 %310  ;;  %v313_v55 = vsel %vm312_vm7, %v305_v53, %v307_v50 }
  0xe2   : > { %365 = vmatpush1.bf16.msra.mxu0 %v313_v55  ;;  %v315_v56 = vsel %vm312_vm7, %v309_v51, %v311_v54 }
  0xe3   : > { %406 = vmatpush1.bf16.msra.mxu1 %v315_v56 }
  0xe4   : > { %v322_v57 = vpop.permute.xlu0 %321  ;;  %407 = vmatprep.subr.bf16.mxu1 %v708_v0 }
  0xe5   : > { %v324_v58 = vpop.permute.xlu1 %323 }
  0xe6   : > { %v329_v59 = vsel %vm327_vm8, %v322_v57, %v324_v58 }
  0xe7   : > { %366 = vmatprep.subr.bf16.mxu0 %v329_v59 }
  0xe8   : > { %v320_v60 = vpop.permute.xlu0 %319 }
  0xe9   : > { %v326_v61 = vpop.permute.xlu1 %325  ;;  %v328_v62 = vsel %vm327_vm8, %v320_v60, %v322_v57 }
  0xea   : > { %367 = vmatpush1.bf16.msra.mxu0 %v328_v62  ;;  %v330_v1 = vsel %vm327_vm8, %v324_v58, %v326_v61 }
  0xeb   : > { %408 = vmatpush1.bf16.msra.mxu1 %v330_v1 }
  0xed   : > { %383 = vmatmul.mubr.bf16.vlgmr.msra.gmra.mrb[0].mxu0 %v531_v63 }
  0xee   : > { %424 = vmatmul.mubr.bf16.vlgmr.msra.gmra.mrb[0].mxu1 %v531_v63 }
  0xf9   : > { %v338_v2 = vpop.permute.xlu0 %337 }
 0x1c0   : > { %v384_v0 = vpop.f32.mrb[0].mxu0 }
 0x1c1   : > { %v385_v3 = vadd.f32 %v384_v0, %v338_v2  ;;  %v425_v4 = vpop.f32.mrb[0].mxu1  ;;  %v386_v6 = vpop.f32.mrb[1].mxu0 }
 0x1c2   : > { %v426_v7 = vadd.f32 %v425_v4, %v338_v2  ;;  %v387_v8 = vadd.f32 %v386_v6, %v338_v2  ;;  %v427_v9 = vpop.f32.mrb[1].mxu1  ;;  %v388_v5 = vpop.f32.mrb[2].mxu0 }
 0x1c3   : > { %431 = vst [vmem:[%s188_s9] sm:$0xff] %v385_v3  ;;  %v428_v10 = vpop.f32.mrb[2].mxu1  ;;  %v389_v11 = vpop.f32.mrb[3].mxu0 }
 0x1c4   : > { %433 = vst [vmem:[%s188_s9 + $0x10] sm:$0xff] %v426_v7  ;;  %432 = vst [vmem:[%s188_s9 + $0x8] sm:$0xff] %v387_v8  ;;  %v429_v12 = vpop.f32.mrb[3].mxu1 }
 0x1c5   : > { %650 = shalt.err (!%p647_p2)
}
 0x1c6   : > { %s651_s5 = scalar_lea.hbm %s877_s23, 384  ;;  %s655_s22 = scalar_lea.hbm %s924_s3, 768 }
 0x1c7   : > { %p652_p4 = scmp.ne.s32.totalorder %s877_s23, %s651_s5  ;;  %p656_p9 = scmp.lt.u32.totalorder %s877_s23, %s924_s3 }
 0x1c8   : > { %p657_p1 = scmp.lt.u32.totalorder %s655_s22, %s651_s5  ;;  %p659_p6 = scmp.lt.u32.totalorder %s651_s5, %s877_s23 }
 0x1c9   : > { %p653_p5 = pnand %p652_p4, %p931_p11 }
 0x1ca   : > { %p658_p3 = por %p657_p1, %p656_p9 }
 0x1cb   : > { %p654_p7 = pneg %p653_p5 }
 0x1cc   : > { %p660_p12 = por %p659_p6, %p658_p3 }
 0x1ce   : > { %p661_p13 = pnand %p660_p12, %p654_p7 }
 0x1d0   : > { %664 = shalt.err (!%p661_p13)
}
 0x1d1   : > { %543 = dma.vmem_to_hbm [thread:$0]  (%p931_p11), %s879_s10, 384, %s877_s23, %s435_s16  }
 0x1d2 PF: > { %s461_s28 = sand.u32 1, %s691_s12   ;;  %p932_p8 = scmp.ne.s32.totalorder %s929_s25, 0 }
 0x1d3   : > { %p933_p10 = scmp.ge.s32.totalorder %s703_s15, 2  ;;  %s462_s29 = scalar_lea.sflag [#allocation4], %s461_s28 }
 0x1d5   : > { %p550_p0 = pnand %p933_p10, %p932_p8 }
 0x1d7   : > { %686 = dma.done.wait (!%p550_p0), %s462_s29, 384  }
 0x1d8   : > { %688 = vsyncadd (!%p550_p0), %s462_s29, 4294966912  ;;  %p16_p2 = scmp.ge.s32.totalorder %s763_s18, 4   ;;  %s934_s12 = smov %s695_s13 }
 0x1d9   : > { %s935_s13 = smov %s699_s14  ;;  %s936_s14 = smov %s775_s21 }
 0x1da   : > { %s937_s15 = smov %s763_s18  ;;  %18 = sbr.rel (!%p16_p2) target bundleno = 5 (0x5), region = 77 }
 0x1e1   :  { %467 = vsyncpa [#allocation3], 1 }
 0x1e2   :  { %469 = vsyncpa [#allocation3 + $0x1], 1 }
 0x1e3   :  { %470 = vsyncpa [#allocation4], 1 }
 0x1e4   :  { %472 = vsyncpa [#allocation4 + $0x1], 1 }

</bundles_post_ra>
